<compile_context>
chip_gen: v7x
topology: tpu7x:2x2x1
jax: 0.10.0
libtpu: 0.0.40
codegen_flags: <defaults>
</compile_context>

<pallas_src>
import jax
import jax.numpy as jnp
from jax.experimental import pallas as pl
from jax.experimental.pallas import tpu as pltpu

LEAKY_SLOPE = 0.01   # nn.LeakyReLU default
BN_EPS = 1e-5        # nn.BatchNorm3d default
LANE = 128


def _round_up(x, m):
    return ((x + m - 1) // m) * m


# ---------------------------------------------------------------------------
# Pallas kernel: acc += (tm, tk)bf16 @ (tk, Cp)bf16 ; on last K step:
#                out = LeakyReLU(acc + bias)
# ---------------------------------------------------------------------------
def _fused_conv_kernel(x_ref, w_ref, bias_ref, o_ref, acc_ref):
    k = pl.program_id(1)

    @pl.when(k == 0)
    def _():
        acc_ref[...] = jnp.zeros_like(acc_ref)

    acc_ref[...] += jnp.dot(x_ref[...], w_ref[...],
                            preferred_element_type=jnp.float32)

    @pl.when(k == pl.num_programs(1) - 1)
    def _():
        y = acc_ref[...] + bias_ref[...]
        o_ref[...] = jnp.where(y >= 0, y, LEAKY_SLOPE * y).astype(o_ref.dtype)


# ---------------------------------------------------------------------------
# Glue: im2col for NDHWC 3-D conv (zero padding, arbitrary stride)
# ---------------------------------------------------------------------------
def _im2col_ndhwc(x, k, stride, pad):
    N, D, H, W, C = x.shape
    xp = jnp.pad(x, ((0, 0), (pad, pad), (pad, pad), (pad, pad), (0, 0)))
    Do = (D + 2 * pad - k) // stride + 1
    Ho = (H + 2 * pad - k) // stride + 1
    Wo = (W + 2 * pad - k) // stride + 1
    cols = []
    for kd in range(k):
        for kh in range(k):
            for kw in range(k):
                sl = xp[:, kd:kd + stride * (Do - 1) + 1:stride,
                           kh:kh + stride * (Ho - 1) + 1:stride,
                           kw:kw + stride * (Wo - 1) + 1:stride, :]
                cols.append(sl)
    # feature order: (kd, kh, kw) outer, Cin inner
    patches = jnp.concatenate(cols, axis=-1)          # [N, Do, Ho, Wo, k^3*C]
    return patches.reshape(N * Do * Ho * Wo, k * k * k * C), (N, Do, Ho, Wo)


# ---------------------------------------------------------------------------
# Tile selection: multiples of 128, >=2 grid steps on the parallel M axis
# when possible (v7x has 2 TensorCores), clamped to a v7x-safe VMEM budget.
# ---------------------------------------------------------------------------
def _choose_tiles(M, K, cout_pad):
    tk = min(_round_up(K, LANE), 1024)
    tm = min(1024, max(LANE, _round_up(pl.cdiv(M, 2), LANE)))

    def vmem_bytes(tm_, tk_):
        return (2 * tm_ * tk_ * 2            # X tiles, bf16, double-buffered
                + 2 * tk_ * cout_pad * 2     # W tiles, bf16, double-buffered
                + 2 * cout_pad * 4 * 2       # bias tiles, f32
                + 2 * tm_ * cout_pad * 4     # output tiles, f32
                + tm_ * cout_pad * 4)        # f32 accumulator scratch

    budget = 40 * 1024 * 1024                # headroom inside v7x's 64 MiB VMEM
    while tm > LANE and vmem_bytes(tm, tk) > budget:
        tm -= LANE
    while tk > LANE and vmem_bytes(tm, tk) > budget:
        tk -= LANE
    return tm, tk


# ---------------------------------------------------------------------------
# One Conv3d + BatchNorm3d(eval) + LeakyReLU block
# ---------------------------------------------------------------------------
def conv3d_bn_lrelu(x_ndhwc, w_oik3, b, gamma, beta, run_mean, run_var, stride):
    Cout, Cin, ksz = w_oik3.shape[0], w_oik3.shape[1], w_oik3.shape[2]
    pad = (ksz - 1) // 2

    X, (N, Do, Ho, Wo) = _im2col_ndhwc(x_ndhwc, ksz, stride, pad)
    M, K = X.shape
    Cp = _round_up(Cout, LANE)               # lane-dense output channels

    # Fold conv bias + BN(eval) affine: scale goes into the weight columns,
    # shift stays as a single per-channel bias in the epilogue.
    s = (gamma / jnp.sqrt(run_var + BN_EPS)).astype(jnp.float32)
    Wm = jnp.transpose(w_oik3, (2, 3, 4, 1, 0)).reshape(K, Cout)
    Wm = Wm.astype(jnp.float32) * s[None, :]
    fused_bias = ((b - run_mean) * s + beta).astype(jnp.float32)

    tm, tk = _choose_tiles(M, K, Cp)
    Mp = _round_up(M, tm)
    Kp = _round_up(K, tk)

    # Zero-pad to tile multiples; cast matmul operands to bf16 (f32 accumulate).
    Xp = jnp.zeros((Mp, Kp), jnp.bfloat16).at[:M, :K].set(X.astype(jnp.bfloat16))
    Wp = jnp.zeros((Kp, Cp), jnp.bfloat16).at[:K, :Cout].set(Wm.astype(jnp.bfloat16))
    Bp = jnp.zeros((1, Cp), jnp.float32).at[0, :Cout].set(fused_bias)

    grid = (Mp // tm, Kp // tk)

    out = pl.pallas_call(
        _fused_conv_kernel,
        out_shape=jax.ShapeDtypeStruct((Mp, Cp), jnp.float32),
        grid_spec=pltpu.PrefetchScalarGridSpec(
            num_scalar_prefetch=0,
            grid=grid,
            in_specs=[
                pl.BlockSpec((tm, tk), lambda i, k: (i, k)),   # im2col tile (bf16)
                pl.BlockSpec((tk, Cp), lambda i, k: (k, 0)),   # weight tile (bf16)
                pl.BlockSpec((1, Cp), lambda i, k: (0, 0)),    # fused BN bias (f32)
            ],
            out_specs=pl.BlockSpec((tm, Cp), lambda i, k: (i, 0)),
            scratch_shapes=[pltpu.VMEM((tm, Cp), jnp.float32)],
        ),
        compiler_params=pltpu.CompilerParams(
            dimension_semantics=("parallel", "arbitrary"),
            vmem_limit_bytes=48 * 1024 * 1024,
        ),
    )(Xp, Wp, Bp)

    out = out[:M, :Cout].astype(x_ndhwc.dtype)
    return out.reshape(N, Do, Ho, Wo, Cout)


# ---------------------------------------------------------------------------
# conv_down forward (matches the nn.Sequential in the PyTorch module)
# ---------------------------------------------------------------------------
def conv_down_forward(x_ncdhw, params, k=(3, 3)):
    stride = 2 if k[0] == 3 else 1
    x = jnp.transpose(x_ncdhw, (0, 2, 3, 4, 1))      # NCDHW -> NDHWC
    x = conv3d_bn_lrelu(x, *params["block1"], stride=stride)
    x = conv3d_bn_lrelu(x, *params["block2"], stride=1)
    return jnp.transpose(x, (0, 4, 1, 2, 3))         # NDHWC -> NCDHW


def init_params(key, idim, odim, k=(3, 3)):
    ks = jax.random.split(key, 12)

    def conv_bn(keys, cin, cout, ksize):
        kw, kb, kg, kbe, km, kv = keys
        w = 0.1 * jax.random.normal(kw, (cout, cin, ksize, ksize, ksize),
                                    jnp.float32)
        b = 0.05 * jax.random.normal(kb, (cout,), jnp.float32)
        # Non-trivial eval-mode BatchNorm stats so the fused affine is exercised.
        gamma = 1.0 + 0.1 * jax.random.normal(kg, (cout,), jnp.float32)
        beta = 0.1 * jax.random.normal(kbe, (cout,), jnp.float32)
        run_mean = 0.1 * jax.random.normal(km, (cout,), jnp.float32)
        run_var = 1.0 + 0.2 * jax.random.uniform(kv, (cout,), jnp.float32)
        return (w, b, gamma, beta, run_mean, run_var)

    return {
        "block1": conv_bn(ks[0:6], idim, odim, k[0]),
        "block2": conv_bn(ks[6:12], odim, odim, k[1]),
    }


# ---------------------------------------------------------------------------
# Pure-JAX reference (lax conv + eval BN + LeakyReLU) for a correctness check
# ---------------------------------------------------------------------------
def _ref_block(x_ncdhw, w, b, gamma, beta, rm, rv, stride, pad):
    y = jax.lax.conv_general_dilated(
        x_ncdhw, w, window_strides=(stride,) * 3,
        padding=[(pad, pad)] * 3,
        dimension_numbers=("NCDHW", "OIDHW", "NCDHW"),
        precision=jax.lax.Precision.HIGHEST)
    y = y + b.reshape(1, -1, 1, 1, 1)
    s = (gamma / jnp.sqrt(rv + BN_EPS)).reshape(1, -1, 1, 1, 1)
    y = (y - rm.reshape(1, -1, 1, 1, 1)) * s + beta.reshape(1, -1, 1, 1, 1)
    return jnp.where(y >= 0, y, LEAKY_SLOPE * y)


def conv_down_reference(x_ncdhw, params, k=(3, 3)):
    stride = 2 if k[0] == 3 else 1
    y = _ref_block(x_ncdhw, *params["block1"], stride=stride, pad=(k[0] - 1) // 2)
    y = _ref_block(y, *params["block2"], stride=1, pad=(k[1] - 1) // 2)
    return y


if __name__ == "__main__":
    key = jax.random.PRNGKey(0)
    k_x, k_p = jax.random.split(key)

    idim, odim = 4, 8
    # PyTorch Conv3d input: NCDHW
    x = jax.random.normal(k_x, (2, idim, 16, 16, 16), jnp.float32)
    params = init_params(k_p, idim, odim, k=(3, 3))

    out = conv_down_forward(x, params, k=(3, 3))
    out = jax.block_until_ready(out)

    # stride-2 first conv: (2, 8, 8, 8, 8)
    assert out.shape == (2, odim, 8, 8, 8), out.shape

    # Correctness vs f32 reference (bf16 matmul operands -> loose tolerance).
    ref = jax.block_until_ready(conv_down_reference(x, params, k=(3, 3)))
    max_err = float(jnp.max(jnp.abs(out - ref)))
    assert max_err < 0.1, f"max abs error {max_err}"

    print("KERNEL_OK")
</pallas_src>

<mosaic_0001>
module attributes {stable_mosaic.version = 11 : i64} {
  func.func @_fused_conv_kernel(%arg0: i32, %arg1: i32, %arg2: memref<512x128xbf16, #tpu.memory_space<vmem>>, %arg3: memref<128x128xbf16, #tpu.memory_space<vmem>>, %arg4: memref<1x128xf32, #tpu.memory_space<vmem>>, %arg5: memref<512x128xf32, #tpu.memory_space<vmem>>, %arg6: memref<512x128xf32, #tpu.memory_space<vmem>>) attributes {dimension_semantics = [#tpu.dimension_semantics<parallel>, #tpu.dimension_semantics<arbitrary>], iteration_bounds = array<i64: 2, 1>, scalar_prefetch = 0 : i64, scratch_operands = 1 : i64, tpu.core_type = #tpu.core_type<tc>, window_params = [{transform_indices = @transform_0, window_bounds = array<i64: 512, 128>}, {transform_indices = @transform_1, window_bounds = array<i64: 128, 128>}, {pipeline_mode = #tpu.pipeline_mode<synchronous>, transform_indices = @transform_2, window_bounds = array<i64: 1, 128>}, {transform_indices = @transform_3, window_bounds = array<i64: 512, 128>}]} {
    %c0_i32 = arith.constant 0 : i32
    %0 = arith.cmpi eq, %arg1, %c0_i32 : i32
    %1 = arith.extui %0 : i1 to i32
    %c0_i32_0 = arith.constant 0 : i32
    %2 = arith.cmpi ne, %1, %c0_i32_0 : i32
    scf.if %2 {
      %cst_10 = arith.constant 0.000000e+00 : f32
      %12 = vector.broadcast %cst_10 : f32 to vector<512x128xf32>
      %c0_11 = arith.constant 0 : index
      %c0_12 = arith.constant 0 : index
      %13 = vector.load %arg6[%c0_11, %c0_12] : memref<512x128xf32, #tpu.memory_space<vmem>>, vector<512x128xf32>
      tpu.vector_store %arg6[%c0_11, %c0_12], %12 {strides = array<i32>} : memref<512x128xf32, #tpu.memory_space<vmem>>, vector<512x128xf32>,
    } else {
    }
    %c0 = arith.constant 0 : index
    %c0_1 = arith.constant 0 : index
    %3 = vector.load %arg6[%c0, %c0_1] : memref<512x128xf32, #tpu.memory_space<vmem>>, vector<512x128xf32>
    %c0_2 = arith.constant 0 : index
    %c0_3 = arith.constant 0 : index
    %4 = vector.load %arg2[%c0_2, %c0_3] : memref<512x128xbf16, #tpu.memory_space<vmem>>, vector<512x128xbf16>
    %c0_4 = arith.constant 0 : index
    %c0_5 = arith.constant 0 : index
    %5 = vector.load %arg3[%c0_4, %c0_5] : memref<128x128xbf16, #tpu.memory_space<vmem>>, vector<128x128xbf16>
    %cst = arith.constant dense<0.000000e+00> : vector<512x128xf32>
    %6 = tpu.matmul %4, %5, %cst {dimension_numbers = #tpu.dot_dimension_numbers<[1], [0], [0], [1], [0, 0, 1, 1], [], []>} : vector<512x128xbf16>, vector<128x128xbf16>, vector<512x128xf32> -> vector<512x128xf32>
    %7 = arith.addf %3, %6 : vector<512x128xf32>
    %c0_6 = arith.constant 0 : index
    %c0_7 = arith.constant 0 : index
    %8 = vector.load %arg6[%c0_6, %c0_7] : memref<512x128xf32, #tpu.memory_space<vmem>>, vector<512x128xf32>
    tpu.vector_store %arg6[%c0_6, %c0_7], %7 {strides = array<i32>} : memref<512x128xf32, #tpu.memory_space<vmem>>, vector<512x128xf32>,
    %c0_i32_8 = arith.constant 0 : i32
    %9 = arith.cmpi eq, %arg1, %c0_i32_8 : i32
    %10 = arith.extui %9 : i1 to i32
    %c0_i32_9 = arith.constant 0 : i32
    %11 = arith.cmpi ne, %10, %c0_i32_9 : i32
    scf.if %11 {
      %c0_10 = arith.constant 0 : index
      %c0_11 = arith.constant 0 : index
      %12 = vector.load %arg6[%c0_10, %c0_11] : memref<512x128xf32, #tpu.memory_space<vmem>>, vector<512x128xf32>
      %c0_12 = arith.constant 0 : index
      %c0_13 = arith.constant 0 : index
      %13 = vector.load %arg4[%c0_12, %c0_13] : memref<1x128xf32, #tpu.memory_space<vmem>>, vector<1x128xf32>
      %14 = vector.broadcast %13 : vector<1x128xf32> to vector<512x128xf32>
      %15 = arith.addf %12, %14 : vector<512x128xf32>
      %cst_14 = arith.constant 0.000000e+00 : f32
      %16 = vector.broadcast %cst_14 : f32 to vector<512x128xf32>
      %17 = arith.cmpf oge, %15, %16 : vector<512x128xf32>
      %cst_15 = arith.constant 0.00999999977 : f32
      %18 = vector.broadcast %cst_15 : f32 to vector<512x128xf32>
      %19 = arith.mulf %18, %15 : vector<512x128xf32>
      %20 = arith.select %17, %15, %19 : vector<512x128xi1>, vector<512x128xf32>
      %c0_16 = arith.constant 0 : index
      %c0_17 = arith.constant 0 : index
      %21 = vector.load %arg5[%c0_16, %c0_17] : memref<512x128xf32, #tpu.memory_space<vmem>>, vector<512x128xf32>
      tpu.vector_store %arg5[%c0_16, %c0_17], %20 {strides = array<i32>} : memref<512x128xf32, #tpu.memory_space<vmem>>, vector<512x128xf32>,
    } else {
    }
    return
  }
  func.func @transform_0(%arg0: i32, %arg1: i32) -> (i32, i32) {
    %c0_i32 = arith.constant 0 : i32
    return %arg0, %arg1 : i32, i32
  }
  func.func @transform_1(%arg0: i32, %arg1: i32) -> (i32, i32) {
    %c0_i32 = arith.constant 0 : i32
    %c0_i32_0 = arith.constant 0 : i32
    return %arg1, %c0_i32 : i32, i32
  }
  func.func @transform_2(%arg0: i32, %arg1: i32) -> (i32, i32) {
    %c0_i32 = arith.constant 0 : i32
    %c0_i32_0 = arith.constant 0 : i32
    %c0_i32_1 = arith.constant 0 : i32
    return %c0_i32, %c0_i32_0 : i32, i32
  }
  func.func @transform_3(%arg0: i32, %arg1: i32) -> (i32, i32) {
    %c0_i32 = arith.constant 0 : i32
    %c0_i32_0 = arith.constant 0 : i32
    return %arg0, %c0_i32 : i32, i32
  }
}

</mosaic_0001>

<bundles_post_ra>
// kernel: tpu_custom_call.1
= control target key start
LH: loop header
LB: loop body
LE: loop exit
PB: predicated region body
PF: predicated region fallthrough
CT: control target
= control target key end

     0   :  { %8 = vsyncpa [#allocation4], 0  ;;  %s2485_s0 = inlined_call_operand.hbm [shape: bf16[1024,128], index: 0, kind: input, shape index: {}]   ;;  %s2486_s1 = inlined_call_operand.hbm [shape: bf16[128,128], index: 1, kind: input, shape index: {}]   ;;  %s2487_s2 = inlined_call_operand.vmem [shape: f32[1,128], index: 2, kind: input, shape index: {}]   ;;  %s2488_s3 = inlined_call_operand.hbm [shape: f32[1024,128], index: 3, kind: output, shape index: {}]  }
   0x1   :  { %10 = vsyncpa [#allocation4 + $0x1], 0 }
   0x2   :  { %11 = vsyncpa [#allocation7], 0 }
   0x3   :  { %12 = vsyncpa [#allocation5], 0 }
   0x4   :  { %14 = vsyncpa [#allocation5 + $0x1], 0  ;;  %s2089_s12 = smov 0   ;;  %s2091_s13 = smov 0  }
   0x5   :  { %s2093_s14 = smov 0   ;;  %s2095_s15 = smov 0  }
   0x6   :  { %s2097_s16 = smov 0   ;;  %s2099_s17 = smov 0  }
   0x7 LB: > { %s1603_s18 = sadd.s32 4294967295, %s2060_s17   ;;  %s1604_s19 = sadd.s32 4294967294, %s2060_s17   ;;  %s2060_s17 = sphi %s2099_s17, %s20_s17   ;;  %s2056_s16 = sphi %s2097_s16, %s2512_s16   ;;  %s2052_s15 = sphi %s2095_s15, %s2511_s15   ;;  %s2048_s14 = sphi %s2093_s14, %s2510_s14   ;;  %s2044_s13 = sphi %s2091_s13, %s2509_s13   ;;  %s2040_s12 = sphi %s2089_s12, %s2508_s12  }
   0x8   : > { %p54_p0 = scmp.ne.s32.totalorder %s2044_s13, %s2040_s12  ;;  %p2123_p1 = scmp.eq.s32.totalorder %s1603_s18, 0 }
   0x9   : > { %p2127_p2 = scmp.eq.s32.totalorder %s1603_s18, 1  ;;  %p131_p3 = scmp.eq.s32.totalorder %s1604_s19, 1 }
   0xa   : > { %s2493_s20 = scalar_select %p2123_p1, 1, 0 }
   0xb   : > { %s2494_s21 = scalar_select %p2127_p2, 1, 0 }
   0xc   : > { %p2133_p4 = por %p2123_p1, %p54_p0  ;;  %p1605_p5 = scmp.ge.s32.totalorder %s2060_s17, 1 }
   0xd   : > { %p2138_p6 = por %p131_p3, %p54_p0  ;;  %p138_p7 = scmp.lt.s32.totalorder %s2060_s17, 3 }
   0xe   : > { %s2495_s22 = scalar_select %p2133_p4, 1, 0 }
   0xf   : > { %s2496_s23 = scalar_select %p2138_p6, 1, 0 }
  0x10   : > { %p2143_p8 = pnand %p1605_p5, %p138_p7  ;;  %s2062_s25 = smov [#allocation6]  }
  0x11   : > { %s153_s26 = sshll.u32 %s2062_s25, 4  ;;  %s32_s28 = sadd.s32 1, %s2056_s16  ;;  %s154_s26 = int_to_ptr.vmem [resolvable:$true] %s153_s26 }
  0x12   : > { %s2497_s24 = scalar_select %p2143_p8, 1, 0 }
  0x13   : > { %p1807_p9 = pneg %p2143_p8  ;;  %s1916_s4 = scalar_lea.hbm %s2486_s1, 1024 }
  0x14   : > { %p1917_p12 = scmp.ne.s32.totalorder %s2486_s1, %s1916_s4  ;;  %p1923_p5 = scmp.lt.u32.totalorder %s1916_s4, %s2486_s1 }
  0x15   : > { %p2152_p11 = pnand %p1807_p9, %p2123_p1 }
  0x17   : > { %p1918_p13 = pneg %p2152_p11 }
  0x19   : > { %p1919_p0 = pnand %p1918_p13, %p1917_p12 }
  0x1b   : > { %p1920_p3 = pneg %p1919_p0 }
  0x1d   : > { %p1925_p7 = pnand %p1923_p5, %p1920_p3 }
  0x1f   : > { %1928 = shalt.err (!%p1925_p7)
}
  0x20   : > { %s1929_s9 = scalar_lea.vmem %s154_s26, 1024  ;;  %p1937_p1 = scmp.lt.s32.totalorder %s154_s26, %s154_s26 }
  0x21   : > { %p1930_p9 = scmp.ne.s32.totalorder %s154_s26, %s1929_s9  ;;  %p1938_p4 = scmp.lt.s32.totalorder %s1929_s9, %s1929_s9 }
  0x23   : > { %p1932_p10 = pnand %p1930_p9, %p1918_p13  ;;  %p1939_p8 = por %p1938_p4, %p1937_p1 }
  0x25   : > { %p1933_p6 = pneg %p1932_p10 }
  0x27   : > { %p1940_p2 = pnand %p1939_p8, %p1933_p6 }
  0x29   : > { %1943 = shalt.err (!%p1940_p2)
}
  0x2a   : > { %s2063_s10 = smov 64   ;;  %s2064_s11 = smov 4  }
  0x2b   : > { %1810 = dma.hbm_to_vmem [thread:$0]  (!%p2152_p11), %s2486_s1, 1024, %s154_s26, [#allocation7], %s2063_s10, %s2063_s10, %s2064_s11  }
  0x2c   : > { %p34_p1 = scmp.ge.s32.totalorder %s32_s28, 2  ;;  %s41_s25 = sadd.s32 1, %s2048_s14 }
  0x2d   : > { %p48_p2 = scmp.ne.s32.totalorder %s2048_s14, %s2044_s13  ;;  %p49_p4 = scmp.eq.s32.totalorder %s2060_s17, 0 }
  0x2e   : > { %s2514_s28 = smov (%p34_p1, %s32_s28), 0  ;;  %p2500_p8 = scmp.ne.s32.totalorder %s2494_s21, 0 }
  0x2f   : > { %p2182_p6 = por %p49_p4, %p48_p2  ;;  %s36_s30 = ssub.s32 %s2056_s16, %s2514_s28 }
  0x30   : > { %p2188_p10 = por %p2500_p8, %p48_p2  ;;  %p1820_p12 = scmp.lt.s32.totalorder %s2060_s17, 2 }
  0x31   : > { %p39_p11 = scmp.eq.s32.totalorder %s36_s30, 0  ;;  %s170_s26 = sand.u32 1, %s2048_s14  }
  0x32   : > { %s1608_s4 = sshll.u32 %s170_s26, 8  ;;  %s1661_s6 = sshll.u32 %s2056_s16, 12 }
  0x33   : > { %s2197_s5 = scalar_select %p39_p11, %s2048_s14, %s41_s25  }
  0x34   : > { %s2203_s9 = scalar_lea.hbm %s2485_s0, %s1661_s6  ;;  %s174_s21 = scalar_lea.vmem [#allocation3], %s1608_s4 }
  0x35   : > { %s182_s18 = sshll.u32 %s174_s21, 4  ;;  %p2209_p13 = pnand %p1820_p12, %p2182_p6  ;;  %s2205_s18 = int_to_ptr.vmem [resolvable:$true] %s182_s18 }
  0x36   : > { %s2213_s25 = scalar_lea.sflag [#allocation4], %s170_s26  ;;  %s1944_s30 = scalar_lea.hbm %s2203_s9, 4096 }
  0x37   : > { %p1945_p0 = scmp.ne.s32.totalorder %s2203_s9, %s1944_s30  ;;  %p1946_p3 = pneg %p2209_p13 }
  0x38   : > { %s1949_s29 = scalar_lea.hbm %s2485_s0, 8192  ;;  %p1950_p9 = scmp.lt.u32.totalorder %s2203_s9, %s2485_s0 }
  0x39   : > { %p1947_p5 = pnand %p1946_p3, %p1945_p0  ;;  %p1951_p1 = scmp.lt.u32.totalorder %s1949_s29, %s1944_s30 }
  0x3a   : > { %p1953_p4 = scmp.lt.u32.totalorder %s1944_s30, %s2203_s9 }
  0x3b   : > { %p1948_p7 = pneg %p1947_p5  ;;  %p1952_p2 = por %p1951_p1, %p1950_p9 }
  0x3d   : > { %p1954_p6 = por %p1953_p4, %p1952_p2 }
  0x3f   : > { %p1955_p8 = pnand %p1954_p6, %p1948_p7 }
  0x41   : > { %1958 = shalt.err (!%p1955_p8)
}
  0x42   : > { %s1959_s26 = scalar_lea.vmem %s2205_s18, 4096  ;;  %s2065_s21 = smov [#allocation3]  }
  0x43   : > { %p1960_p12 = scmp.ne.s32.totalorder %s2205_s18, %s1959_s26  ;;  %s1964_s4 = sshll.u32 %s2065_s21, 4  ;;  %s1965_s4 = int_to_ptr.vmem [resolvable:$false] %s1964_s4 }
  0x44   : > { %s1966_s6 = scalar_lea.vmem %s1965_s4, 8192  ;;  %p1967_p5 = scmp.lt.s32.totalorder %s2205_s18, %s1965_s4 }
  0x45   : > { %p1962_p11 = pnand %p1960_p12, %p1946_p3  ;;  %p1968_p9 = scmp.lt.s32.totalorder %s1966_s6, %s1959_s26 }
  0x47   : > { %p1963_p0 = pneg %p1962_p11  ;;  %p1969_p1 = por %p1968_p9, %p1967_p5 }
  0x49   : > { %p1970_p2 = pnand %p1969_p1, %p1963_p0 }
  0x4b   : > { %1973 = shalt.err (!%p1970_p2)
}
  0x4c   : > { %1814 = dma.hbm_to_vmem [thread:$0]  (!%p2209_p13), %s2203_s9, 4096, %s2205_s18, %s2213_s25, %s2063_s10, %s2063_s10, %s2064_s11  }
  0x4d   : > { %p2503_p3 = scmp.ne.s32.totalorder %s2497_s24, 0 }
  0x4e   : > { %s2247_s30 = sand.u32 (!%p2503_p3), 1, %s2044_s13   ;;  %p2504_p7 = scmp.ne.s32.totalorder (!%p2503_p3), %s2495_s22, 0 }
  0x4f   : > { %194 = sbr.rel (%p2503_p3) target bundleno = 418 (0x1a2), region = 32  ;;  %s1612_s29 = sshll.u32 (!%p2503_p3), %s2247_s30, 8 }
  0x50   : > { %s197_s7 = scalar_lea.sflag (!%p2503_p3), [#allocation4], %s2247_s30  ;;  %s2251_s8 = scalar_lea.vmem (!%p2503_p3), [#allocation3], %s1612_s29 }
  0x56   : > { %2027 = dma.done.wait (%p2504_p7), %s197_s7, 4096  }
  0x57   : > { %2029 = vsyncadd (%p2504_p7), %s197_s7, 4294963200  ;;  %p2505_p13 = scmp.ne.s32.totalorder %s2493_s20, 0 }
  0x59   : > { %2031 = dma.done.wait (%p2505_p13), [#allocation7], 1024  }
  0x5a   : > { %2033 = vsyncadd (%p2505_p13), [#allocation7], 4294966272  ;;  %v1876_v0 = vld [vmem:[#allocation6] sm:$0xff]   ;;  %v1877_v1 = vld [vmem:[#allocation6 + $0x8] sm:$0xff]   ;;  %s1614_s24 = sshll.u32 %s2247_s30, 9  ;;  %s1662_s11 = sshll.u32 %s2052_s15, 13 }
  0x5b   : > { %1703 = vmatprep.subr.bf16.mxu0 %v1876_v0  ;;  %1783 = vmatprep.subr.bf16.mxu1 %v1876_v0  ;;  %v1878_v2 = vld [vmem:[#allocation6 + $0x10] sm:$0xff]   ;;  %v1879_v3 = vld [vmem:[#allocation6 + $0x18] sm:$0xff]   ;;  %v1884_v4 = vld [vmem:[%s2251_s8] sm:$0xff]   ;;  %s2305_s10 = scalar_lea.vmem [#allocation8], %s1614_s24  ;;  %s2430_s19 = scalar_lea.hbm %s2488_s3, %s1662_s11 }
  0x5c   : > { %1704 = vmatpush3.bf16.msra.mxu0 %v1876_v0  ;;  %1791 = vmatpush3.bf16.msra.mxu1 %v1876_v0  ;;  %v1885_v5 = vld [vmem:[%s2251_s8 + $0x80] sm:$0xff]   ;;  %v1881_v7 = vld [vmem:[#allocation6 + $0x28] sm:$0xff]   ;;  %v1882_v8 = vld [vmem:[#allocation6 + $0x30] sm:$0xff]   ;;  %s1508_s9 = sshll.u32 %s2305_s10, 4  ;;  %s1495_s25 = scalar_lea.sflag [#allocation5], %s2247_s30  ;;  %s2432_s9 = int_to_ptr.vmem [resolvable:$true] %s1508_s9 }
  0x5d   : > { %1705 = vmatprep.subr.bf16.mxu0 %v1877_v1  ;;  %1784 = vmatprep.subr.bf16.mxu1 %v1877_v1  ;;  %v1880_v6 = vld [vmem:[#allocation6 + $0x20] sm:$0xff]   ;;  %v1883_v9 = vld [vmem:[#allocation6 + $0x38] sm:$0xff]   ;;  %v1886_v10 = vld [vmem:[%s2251_s8 + $0x8] sm:$0xff]   ;;  %s1974_s26 = scalar_lea.vmem %s2432_s9, 8192  ;;  %s2066_s21 = smov [#allocation8]  }
  0x5e   : > { %1719 = vmatprep.mubr.bf16.mxu0 %v1884_v4  ;;  %1751 = vmatprep.mubr.bf16.mxu1 %v1885_v5  ;;  %v1887_v11 = vld [vmem:[%s2251_s8 + $0x88] sm:$0xff]   ;;  %v1888_v12 = vld [vmem:[%s2251_s8 + $0x10] sm:$0xff]   ;;  %v1890_v14 = vld [vmem:[%s2251_s8 + $0x18] sm:$0xff]   ;;  %p1975_p4 = scmp.ne.s32.totalorder %s2432_s9, %s1974_s26  ;;  %s1978_s4 = sshll.u32 %s2066_s21, 4  ;;  %s1979_s4 = int_to_ptr.vmem [resolvable:$false] %s1978_s4 }
  0x5f   : > { %v1889_v13 = vld [vmem:[%s2251_s8 + $0x90] sm:$0xff]   ;;  %v1891_v15 = vld [vmem:[%s2251_s8 + $0x98] sm:$0xff]   ;;  %v1892_v16 = vld [vmem:[%s2251_s8 + $0x20] sm:$0xff]   ;;  %s1980_s6 = scalar_lea.vmem %s1979_s4, 16384  ;;  %p1981_p12 = scmp.lt.s32.totalorder %s2432_s9, %s1979_s4 }
  0x60   : > { %1706 = vmatpush3.bf16.msra.mxu0 %v1877_v1  ;;  %1792 = vmatpush3.bf16.msra.mxu1 %v1877_v1  ;;  %v1893_v17 = vld [vmem:[%s2251_s8 + $0xa0] sm:$0xff]   ;;  %v1894_v18 = vld [vmem:[%s2251_s8 + $0x28] sm:$0xff]   ;;  %v1896_v20 = vld [vmem:[%s2251_s8 + $0x30] sm:$0xff]   ;;  %p1976_p6 = pnand %p1975_p4, %p2188_p10  ;;  %p1982_p11 = scmp.lt.s32.totalorder %s1980_s6, %s1974_s26 }
  0x61   : > { %1707 = vmatprep.subr.bf16.mxu0 %v1878_v2  ;;  %1785 = vmatprep.subr.bf16.mxu1 %v1878_v2  ;;  %v1895_v19 = vld [vmem:[%s2251_s8 + $0xa8] sm:$0xff]   ;;  %v1897_v21 = vld [vmem:[%s2251_s8 + $0xb0] sm:$0xff]   ;;  %v1898_v22 = vld [vmem:[%s2251_s8 + $0x38] sm:$0xff]  }
  0x62   : > { %v1899_v23 = vld [vmem:[%s2251_s8 + $0xb8] sm:$0xff]   ;;  %v1900_v24 = vld [vmem:[%s2251_s8 + $0x40] sm:$0xff]   ;;  %v1902_v26 = vld [vmem:[%s2251_s8 + $0x48] sm:$0xff]   ;;  %p1977_p8 = pneg %p1976_p6  ;;  %p1983_p0 = por %p1982_p11, %p1981_p12 }
  0x63   : > { %v1901_v25 = vld [vmem:[%s2251_s8 + $0xc0] sm:$0xff]   ;;  %v1903_v27 = vld [vmem:[%s2251_s8 + $0xc8] sm:$0xff]   ;;  %v1904_v28 = vld [vmem:[%s2251_s8 + $0x50] sm:$0xff]  }
  0x64   : > { %1708 = vmatpush3.bf16.msra.mxu0 %v1878_v2  ;;  %1793 = vmatpush3.bf16.msra.mxu1 %v1878_v2  ;;  %v1905_v29 = vld [vmem:[%s2251_s8 + $0xd0] sm:$0xff]   ;;  %v1906_v30 = vld [vmem:[%s2251_s8 + $0x58] sm:$0xff]   ;;  %v1908_v32 = vld [vmem:[%s2251_s8 + $0x60] sm:$0xff]   ;;  %p1984_p5 = pnand %p1983_p0, %p1977_p8 }
  0x65   : > { %1709 = vmatprep.subr.bf16.mxu0 %v1879_v3  ;;  %1786 = vmatprep.subr.bf16.mxu1 %v1879_v3  ;;  %v1907_v31 = vld [vmem:[%s2251_s8 + $0xd8] sm:$0xff]   ;;  %v1909_v33 = vld [vmem:[%s2251_s8 + $0xe0] sm:$0xff]   ;;  %v1910_v34 = vld [vmem:[%s2251_s8 + $0x68] sm:$0xff]  }
  0x66   : > { %v1911_v35 = vld [vmem:[%s2251_s8 + $0xe8] sm:$0xff]   ;;  %v1912_v36 = vld [vmem:[%s2251_s8 + $0x70] sm:$0xff]   ;;  %v1914_v38 = vld [vmem:[%s2251_s8 + $0x78] sm:$0xff]  }
  0x67   : > { %v1913_v37 = vld [vmem:[%s2251_s8 + $0xf0] sm:$0xff]   ;;  %v1915_v39 = vld [vmem:[%s2251_s8 + $0xf8] sm:$0xff]   ;;  %v2296_v40 = vld [vmem:[%s2487_s2] ss:$0 sm:$0xff] }
  0x68   : > { %1710 = vmatpush3.bf16.msra.mxu0 %v1879_v3  ;;  %1794 = vmatpush3.bf16.msra.mxu1 %v1879_v3 }
  0x69   : > { %1711 = vmatprep.subr.bf16.mxu0 %v1880_v6  ;;  %1787 = vmatprep.subr.bf16.mxu1 %v1880_v6 }
  0x6c   : > { %1712 = vmatpush3.bf16.msra.mxu0 %v1880_v6  ;;  %1795 = vmatpush3.bf16.msra.mxu1 %v1880_v6 }
  0x6d   : > { %1713 = vmatprep.subr.bf16.mxu0 %v1881_v7  ;;  %1788 = vmatprep.subr.bf16.mxu1 %v1881_v7 }
  0x70   : > { %1714 = vmatpush3.bf16.msra.mxu0 %v1881_v7  ;;  %1796 = vmatpush3.bf16.msra.mxu1 %v1881_v7 }
  0x71   : > { %1715 = vmatprep.subr.bf16.mxu0 %v1882_v8  ;;  %1789 = vmatprep.subr.bf16.mxu1 %v1882_v8 }
  0x74   : > { %1716 = vmatpush3.bf16.msra.mxu0 %v1882_v8  ;;  %1797 = vmatpush3.bf16.msra.mxu1 %v1882_v8 }
  0x75   : > { %1717 = vmatprep.subr.bf16.mxu0 %v1883_v9  ;;  %1790 = vmatprep.subr.bf16.mxu1 %v1883_v9 }
  0x78   : > { %1718 = vmatpush3.bf16.msra.mxu0 %v1883_v9  ;;  %1798 = vmatpush3.bf16.msra.mxu1 %v1883_v9 }
  0x7b   : > { %1720 = vmatmul.mubr.bf16.vlgmr.msra.gmra.mrb[0].mxu0 %v1886_v10  ;;  %1752 = vmatmul.mubr.bf16.vlgmr.msra.gmra.mrb[0].mxu1 %v1887_v11 }
  0x7c   : > { %1723 = vmatprep.mubr.bf16.mxu0 %v1888_v12  ;;  %1755 = vmatprep.mubr.bf16.mxu1 %v1889_v13 }
  0x83   : > { %1724 = vmatmul.mubr.bf16.gmra.mrb[4].mxu0 %v1890_v14  ;;  %1756 = vmatmul.mubr.bf16.gmra.mrb[4].mxu1 %v1891_v15 }
  0x84   : > { %1727 = vmatprep.mubr.bf16.mxu0 %v1892_v16  ;;  %1759 = vmatprep.mubr.bf16.mxu1 %v1893_v17 }
  0x8b   : > { %1728 = vmatmul.mubr.bf16.gmra.mrb[8].mxu0 %v1894_v18  ;;  %1760 = vmatmul.mubr.bf16.gmra.mrb[8].mxu1 %v1895_v19 }
  0x8c   : > { %1731 = vmatprep.mubr.bf16.mxu0 %v1896_v20  ;;  %1763 = vmatprep.mubr.bf16.mxu1 %v1897_v21 }
  0x93   : > { %1732 = vmatmul.mubr.bf16.gmra.mrb[12].mxu0 %v1898_v22  ;;  %1764 = vmatmul.mubr.bf16.gmra.mrb[12].mxu1 %v1899_v23 }
  0x94   : > { %1735 = vmatprep.mubr.bf16.mxu0 %v1900_v24  ;;  %1767 = vmatprep.mubr.bf16.mxu1 %v1901_v25 }
  0x9b   : > { %1736 = vmatmul.mubr.bf16.gmra.mrb[16].mxu0 %v1902_v26  ;;  %1768 = vmatmul.mubr.bf16.gmra.mrb[16].mxu1 %v1903_v27 }
  0x9c   : > { %1739 = vmatprep.mubr.bf16.mxu0 %v1904_v28  ;;  %1771 = vmatprep.mubr.bf16.mxu1 %v1905_v29 }
  0xa3   : > { %1740 = vmatmul.mubr.bf16.gmra.mrb[20].mxu0 %v1906_v30  ;;  %1772 = vmatmul.mubr.bf16.gmra.mrb[20].mxu1 %v1907_v31 }
  0xa4   : > { %1743 = vmatprep.mubr.bf16.mxu0 %v1908_v32  ;;  %1775 = vmatprep.mubr.bf16.mxu1 %v1909_v33 }
  0xab   : > { %1744 = vmatmul.mubr.bf16.gmra.mrb[24].mxu0 %v1910_v34  ;;  %1776 = vmatmul.mubr.bf16.gmra.mrb[24].mxu1 %v1911_v35 }
  0xac   : > { %1747 = vmatprep.mubr.bf16.mxu0 %v1912_v36  ;;  %1779 = vmatprep.mubr.bf16.mxu1 %v1913_v37 }
  0xb3   : > { %1748 = vmatmul.mubr.bf16.gmra.mrb[28].mxu0 %v1914_v38  ;;  %1780 = vmatmul.mubr.bf16.gmra.mrb[28].mxu1 %v1915_v39 }
 0x14e   : > { %v1721_v41 = vpop.f32.mrb[0].mxu0  ;;  %v1753_v42 = vpop.f32.mrb[0].mxu1 }
 0x14f   : > { %v1176_v43 = vadd.f32 %v1721_v41, %v2296_v40  ;;  %v1208_v44 = vadd.f32 %v1753_v42, %v2296_v40  ;;  %v717_v45 = vpop.f32.mrb[1].mxu0  ;;  %v845_v46 = vpop.f32.mrb[1].mxu1 }
 0x150   : > { %v1174_v47 = vadd.f32 %v2296_v40, %v717_v45  ;;  %v1206_v48 = vadd.f32 %v2296_v40, %v845_v46  ;;  %v1722_v49 = vpop.f32.mrb[2].mxu0  ;;  %v1754_v50 = vpop.f32.mrb[2].mxu1 }
 0x151   : > { %vm1240_vm0 = vcmp.ge.f32.partialorder %v1176_v43, 0.0  ;;  %v1304_v51 = vmul.f32 0.01, %v1176_v43  ;;  %vm1272_vm1 = vcmp.ge.f32.partialorder %v1208_v44, 0.0  ;;  %v1336_v52 = vmul.f32 0.01, %v1208_v44 }
 0x152   : > { %vm1238_vm2 = vcmp.ge.f32.partialorder %v1174_v47, 0.0  ;;  %v1302_v53 = vmul.f32 0.01, %v1174_v47  ;;  %vm1270_vm3 = vcmp.ge.f32.partialorder %v1206_v48, 0.0  ;;  %v1334_v54 = vmul.f32 0.01, %v1206_v48 }
 0x153   : > { %v1368_v55 = vsel %vm1240_vm0, %v1176_v43, %v1304_v51  ;;  %v1400_v56 = vsel %vm1272_vm1, %v1208_v44, %v1336_v52  ;;  %v1177_v57 = vadd.f32 %v1722_v49, %v2296_v40  ;;  %v1209_v58 = vadd.f32 %v1754_v50, %v2296_v40  ;;  %v720_v59 = vpop.f32.mrb[3].mxu0  ;;  %v848_v60 = vpop.f32.mrb[3].mxu1 }
 0x154   : > { %1432 = vst [vmem:[%s2305_s10 + $0x10] sm:$0xff] %v1368_v55  ;;  %1464 = vst [vmem:[%s2305_s10 + $0x110] sm:$0xff] %v1400_v56  ;;  %v1366_v61 = vsel %vm1238_vm2, %v1174_v47, %v1302_v53  ;;  %v1398_v62 = vsel %vm1270_vm3, %v1206_v48, %v1334_v54  ;;  %v1175_v63 = vadd.f32 %v2296_v40, %v720_v59 }
 0x155   : > { %v1207_v0 = vadd.f32 %v2296_v40, %v848_v60  ;;  %1430 = vst [vmem:[%s2305_s10] sm:$0xff] %v1366_v61  ;;  %1462 = vst [vmem:[%s2305_s10 + $0x100] sm:$0xff] %v1398_v62  ;;  %vm1241_vm4 = vcmp.ge.f32.partialorder %v1177_v57, 0.0  ;;  %v1305_v1 = vmul.f32 0.01, %v1177_v57  ;;  %vm1273_vm5 = vcmp.ge.f32.partialorder %v1209_v58, 0.0 }
 0x156   : > { %v1337_v2 = vmul.f32 0.01, %v1209_v58  ;;  %vm1239_vm6 = vcmp.ge.f32.partialorder %v1175_v63, 0.0  ;;  %v1303_v3 = vmul.f32 0.01, %v1175_v63  ;;  %v1725_v7 = vpop.f32.mrb[4].mxu0 }
 0x157   : > { %vm1271_vm7 = vcmp.ge.f32.partialorder %v1207_v0, 0.0  ;;  %v1335_v4 = vmul.f32 0.01, %v1207_v0  ;;  %v1369_v5 = vsel %vm1241_vm4, %v1177_v57, %v1305_v1  ;;  %v1757_v8 = vpop.f32.mrb[4].mxu1  ;;  %v1180_v11 = vadd.f32 %v1725_v7, %v2296_v40  ;;  %v733_v13 = vpop.f32.mrb[5].mxu0 }
 0x158   : > { %v1401_v6 = vsel %vm1273_vm5, %v1209_v58, %v1337_v2  ;;  %1433 = vst [vmem:[%s2305_s10 + $0x18] sm:$0xff] %v1369_v5  ;;  %v1367_v9 = vsel %vm1239_vm6, %v1175_v63, %v1303_v3  ;;  %v1212_v12 = vadd.f32 %v1757_v8, %v2296_v40  ;;  %v861_v14 = vpop.f32.mrb[5].mxu1  ;;  %v1178_v15 = vadd.f32 %v2296_v40, %v733_v13  ;;  %v1726_v17 = vpop.f32.mrb[6].mxu0 }
 0x159   : > { %1465 = vst [vmem:[%s2305_s10 + $0x118] sm:$0xff] %v1401_v6  ;;  %v1399_v10 = vsel %vm1271_vm7, %v1207_v0, %v1335_v4  ;;  %1431 = vst [vmem:[%s2305_s10 + $0x8] sm:$0xff] %v1367_v9  ;;  %v1210_v16 = vadd.f32 %v2296_v40, %v861_v14  ;;  %v1758_v18 = vpop.f32.mrb[6].mxu1  ;;  %vm1244_vm8 = vcmp.ge.f32.partialorder %v1180_v11, 0.0  ;;  %v1308_v19 = vmul.f32 0.01, %v1180_v11 }
 0x15a   : > { %1463 = vst [vmem:[%s2305_s10 + $0x108] sm:$0xff] %v1399_v10  ;;  %vm1276_vm9 = vcmp.ge.f32.partialorder %v1212_v12, 0.0  ;;  %v1340_v20 = vmul.f32 0.01, %v1212_v12  ;;  %vm1242_vm10 = vcmp.ge.f32.partialorder %v1178_v15, 0.0  ;;  %v1181_v25 = vadd.f32 %v1726_v17, %v2296_v40  ;;  %v736_v27 = vpop.f32.mrb[7].mxu0 }
 0x15b   : > { %v1306_v21 = vmul.f32 0.01, %v1178_v15  ;;  %vm1274_vm11 = vcmp.ge.f32.partialorder %v1210_v16, 0.0  ;;  %v1338_v22 = vmul.f32 0.01, %v1210_v16  ;;  %v1372_v23 = vsel %vm1244_vm8, %v1180_v11, %v1308_v19  ;;  %v864_v28 = vpop.f32.mrb[7].mxu1 }
 0x15c   : > { %v1404_v24 = vsel %vm1276_vm9, %v1212_v12, %v1340_v20  ;;  %v1213_v26 = vadd.f32 %v1758_v18, %v2296_v40  ;;  %1436 = vst [vmem:[%s2305_s10 + $0x30] sm:$0xff] %v1372_v23  ;;  %v1179_v31 = vadd.f32 %v2296_v40, %v736_v27  ;;  %v1211_v32 = vadd.f32 %v2296_v40, %v864_v28 }
 0x15d   : > { %1468 = vst [vmem:[%s2305_s10 + $0x130] sm:$0xff] %v1404_v24  ;;  %v1370_v29 = vsel %vm1242_vm10, %v1178_v15, %v1306_v21  ;;  %v1402_v30 = vsel %vm1274_vm11, %v1210_v16, %v1338_v22  ;;  %vm1245_vm12 = vcmp.ge.f32.partialorder %v1181_v25, 0.0  ;;  %v1309_v33 = vmul.f32 0.01, %v1181_v25 }
 0x15e   : > { %1434 = vst [vmem:[%s2305_s10 + $0x20] sm:$0xff] %v1370_v29  ;;  %1466 = vst [vmem:[%s2305_s10 + $0x120] sm:$0xff] %v1402_v30  ;;  %vm1277_vm13 = vcmp.ge.f32.partialorder %v1213_v26, 0.0  ;;  %v1341_v34 = vmul.f32 0.01, %v1213_v26  ;;  %vm1243_vm14 = vcmp.ge.f32.partialorder %v1179_v31, 0.0 }
 0x15f   : > { %v1307_v35 = vmul.f32 0.01, %v1179_v31  ;;  %vm1275_vm15 = vcmp.ge.f32.partialorder %v1211_v32, 0.0  ;;  %v1339_v36 = vmul.f32 0.01, %v1211_v32  ;;  %v1373_v37 = vsel %vm1245_vm12, %v1181_v25, %v1309_v33  ;;  %v1729_v39 = vpop.f32.mrb[8].mxu0 }
 0x160   : > { %v1405_v38 = vsel %vm1277_vm13, %v1213_v26, %v1341_v34  ;;  %v1761_v41 = vpop.f32.mrb[8].mxu1  ;;  %1437 = vst [vmem:[%s2305_s10 + $0x38] sm:$0xff] %v1373_v37  ;;  %v1184_v44 = vadd.f32 %v1729_v39, %v2296_v40  ;;  %v749_v46 = vpop.f32.mrb[9].mxu0 }
 0x161   : > { %1469 = vst [vmem:[%s2305_s10 + $0x138] sm:$0xff] %v1405_v38  ;;  %v1371_v42 = vsel %vm1243_vm14, %v1179_v31, %v1307_v35  ;;  %v1403_v43 = vsel %vm1275_vm15, %v1211_v32, %v1339_v36  ;;  %v1216_v45 = vadd.f32 %v1761_v41, %v2296_v40  ;;  %v877_v47 = vpop.f32.mrb[9].mxu1  ;;  %v1182_v48 = vadd.f32 %v2296_v40, %v749_v46  ;;  %v1730_v50 = vpop.f32.mrb[10].mxu0 }
 0x162   : > { %1435 = vst [vmem:[%s2305_s10 + $0x28] sm:$0xff] %v1371_v42  ;;  %1467 = vst [vmem:[%s2305_s10 + $0x128] sm:$0xff] %v1403_v43  ;;  %v1214_v49 = vadd.f32 %v2296_v40, %v877_v47  ;;  %v1762_v51 = vpop.f32.mrb[10].mxu1  ;;  %vm1248_vm0 = vcmp.ge.f32.partialorder %v1184_v44, 0.0  ;;  %v1312_v52 = vmul.f32 0.01, %v1184_v44  ;;  %v1185_v58 = vadd.f32 %v1730_v50, %v2296_v40 }
 0x163   : > { %vm1280_vm1 = vcmp.ge.f32.partialorder %v1216_v45, 0.0  ;;  %v1344_v53 = vmul.f32 0.01, %v1216_v45  ;;  %vm1246_vm2 = vcmp.ge.f32.partialorder %v1182_v48, 0.0  ;;  %v1310_v54 = vmul.f32 0.01, %v1182_v48 }
 0x164   : > { %vm1278_vm3 = vcmp.ge.f32.partialorder %v1214_v49, 0.0  ;;  %v1342_v55 = vmul.f32 0.01, %v1214_v49  ;;  %v1376_v56 = vsel %vm1248_vm0, %v1184_v44, %v1312_v52  ;;  %v1217_v59 = vadd.f32 %v1762_v51, %v2296_v40  ;;  %v752_v60 = vpop.f32.mrb[11].mxu0  ;;  %v880_v61 = vpop.f32.mrb[11].mxu1 }
 0x165   : > { %v1408_v57 = vsel %vm1280_vm1, %v1216_v45, %v1344_v53  ;;  %1440 = vst [vmem:[%s2305_s10 + $0x50] sm:$0xff] %v1376_v56  ;;  %v1374_v62 = vsel %vm1246_vm2, %v1182_v48, %v1310_v54  ;;  %v1183_v0 = vadd.f32 %v2296_v40, %v752_v60  ;;  %v1215_v1 = vadd.f32 %v2296_v40, %v880_v61 }
 0x166   : > { %1472 = vst [vmem:[%s2305_s10 + $0x150] sm:$0xff] %v1408_v57  ;;  %v1406_v63 = vsel %vm1278_vm3, %v1214_v49, %v1342_v55  ;;  %v1733_v2 = vpop.f32.mrb[12].mxu0  ;;  %v1765_v3 = vpop.f32.mrb[12].mxu1  ;;  %1438 = vst [vmem:[%s2305_s10 + $0x40] sm:$0xff] %v1374_v62  ;;  %vm1249_vm4 = vcmp.ge.f32.partialorder %v1185_v58, 0.0  ;;  %vm1281_vm5 = vcmp.ge.f32.partialorder %v1217_v59, 0.0 }
 0x167   : > { %1470 = vst [vmem:[%s2305_s10 + $0x140] sm:$0xff] %v1406_v63  ;;  %v1313_v4 = vmul.f32 0.01, %v1185_v58  ;;  %v1345_v5 = vmul.f32 0.01, %v1217_v59  ;;  %vm1247_vm6 = vcmp.ge.f32.partialorder %v1183_v0, 0.0  ;;  %v1188_v10 = vadd.f32 %v1733_v2, %v2296_v40 }
 0x168   : > { %v1311_v6 = vmul.f32 0.01, %v1183_v0  ;;  %vm1279_vm7 = vcmp.ge.f32.partialorder %v1215_v1, 0.0  ;;  %v1343_v7 = vmul.f32 0.01, %v1215_v1  ;;  %v1220_v11 = vadd.f32 %v1765_v3, %v2296_v40  ;;  %v765_v12 = vpop.f32.mrb[13].mxu0 }
 0x169   : > { %v1377_v8 = vsel %vm1249_vm4, %v1185_v58, %v1313_v4  ;;  %v1409_v9 = vsel %vm1281_vm5, %v1217_v59, %v1345_v5  ;;  %v893_v13 = vpop.f32.mrb[13].mxu1  ;;  %v1186_v16 = vadd.f32 %v2296_v40, %v765_v12  ;;  %v1734_v18 = vpop.f32.mrb[14].mxu0  ;;  %vm1252_vm8 = vcmp.ge.f32.partialorder %v1188_v10, 0.0 }
 0x16a   : > { %1441 = vst [vmem:[%s2305_s10 + $0x58] sm:$0xff] %v1377_v8  ;;  %1473 = vst [vmem:[%s2305_s10 + $0x158] sm:$0xff] %v1409_v9  ;;  %v1375_v14 = vsel %vm1247_vm6, %v1183_v0, %v1311_v6  ;;  %v1407_v15 = vsel %vm1279_vm7, %v1215_v1, %v1343_v7  ;;  %v1218_v17 = vadd.f32 %v2296_v40, %v893_v13  ;;  %v1766_v19 = vpop.f32.mrb[14].mxu1  ;;  %v1316_v20 = vmul.f32 0.01, %v1188_v10  ;;  %v768_v28 = vpop.f32.mrb[15].mxu0 }
 0x16b   : > { %1439 = vst [vmem:[%s2305_s10 + $0x48] sm:$0xff] %v1375_v14  ;;  %1471 = vst [vmem:[%s2305_s10 + $0x148] sm:$0xff] %v1407_v15  ;;  %vm1284_vm9 = vcmp.ge.f32.partialorder %v1220_v11, 0.0  ;;  %v1348_v21 = vmul.f32 0.01, %v1220_v11  ;;  %vm1250_vm10 = vcmp.ge.f32.partialorder %v1186_v16, 0.0  ;;  %v1189_v26 = vadd.f32 %v1734_v18, %v2296_v40 }
 0x16c   : > { %v1314_v22 = vmul.f32 0.01, %v1186_v16  ;;  %vm1282_vm11 = vcmp.ge.f32.partialorder %v1218_v17, 0.0  ;;  %v1346_v23 = vmul.f32 0.01, %v1218_v17  ;;  %v1380_v24 = vsel %vm1252_vm8, %v1188_v10, %v1316_v20  ;;  %v896_v29 = vpop.f32.mrb[15].mxu1 }
 0x16d   : > { %v1412_v25 = vsel %vm1284_vm9, %v1220_v11, %v1348_v21  ;;  %v1221_v27 = vadd.f32 %v1766_v19, %v2296_v40  ;;  %1444 = vst [vmem:[%s2305_s10 + $0x70] sm:$0xff] %v1380_v24  ;;  %v1187_v32 = vadd.f32 %v2296_v40, %v768_v28  ;;  %v1219_v33 = vadd.f32 %v2296_v40, %v896_v29 }
 0x16e   : > { %1476 = vst [vmem:[%s2305_s10 + $0x170] sm:$0xff] %v1412_v25  ;;  %v1378_v30 = vsel %vm1250_vm10, %v1186_v16, %v1314_v22  ;;  %v1410_v31 = vsel %vm1282_vm11, %v1218_v17, %v1346_v23  ;;  %v1737_v34 = vpop.f32.mrb[16].mxu0  ;;  %v1769_v35 = vpop.f32.mrb[16].mxu1  ;;  %vm1253_vm12 = vcmp.ge.f32.partialorder %v1189_v26, 0.0  ;;  %v1317_v36 = vmul.f32 0.01, %v1189_v26 }
 0x16f   : > { %1442 = vst [vmem:[%s2305_s10 + $0x60] sm:$0xff] %v1378_v30  ;;  %1474 = vst [vmem:[%s2305_s10 + $0x160] sm:$0xff] %v1410_v31  ;;  %vm1285_vm13 = vcmp.ge.f32.partialorder %v1221_v27, 0.0  ;;  %v1349_v37 = vmul.f32 0.01, %v1221_v27  ;;  %vm1251_vm14 = vcmp.ge.f32.partialorder %v1187_v32, 0.0  ;;  %v1192_v43 = vadd.f32 %v1737_v34, %v2296_v40 }
 0x170   : > { %v1315_v38 = vmul.f32 0.01, %v1187_v32  ;;  %vm1283_vm15 = vcmp.ge.f32.partialorder %v1219_v33, 0.0  ;;  %v1347_v39 = vmul.f32 0.01, %v1219_v33  ;;  %v1381_v41 = vsel %vm1253_vm12, %v1189_v26, %v1317_v36  ;;  %v781_v45 = vpop.f32.mrb[17].mxu0 }
 0x171   : > { %v1413_v42 = vsel %vm1285_vm13, %v1221_v27, %v1349_v37  ;;  %v1224_v44 = vadd.f32 %v1769_v35, %v2296_v40  ;;  %v909_v46 = vpop.f32.mrb[17].mxu1  ;;  %1445 = vst [vmem:[%s2305_s10 + $0x78] sm:$0xff] %v1381_v41  ;;  %v1190_v49 = vadd.f32 %v2296_v40, %v781_v45  ;;  %v1738_v51 = vpop.f32.mrb[18].mxu0  ;;  %vm1256_vm0 = vcmp.ge.f32.partialorder %v1192_v43, 0.0 }
 0x172   : > { %1477 = vst [vmem:[%s2305_s10 + $0x178] sm:$0xff] %v1413_v42  ;;  %v1379_v47 = vsel %vm1251_vm14, %v1187_v32, %v1315_v38  ;;  %v1411_v48 = vsel %vm1283_vm15, %v1219_v33, %v1347_v39  ;;  %v1222_v50 = vadd.f32 %v2296_v40, %v909_v46  ;;  %v1770_v52 = vpop.f32.mrb[18].mxu1  ;;  %v1320_v53 = vmul.f32 0.01, %v1192_v43  ;;  %v784_v61 = vpop.f32.mrb[19].mxu0 }
 0x173   : > { %1443 = vst [vmem:[%s2305_s10 + $0x68] sm:$0xff] %v1379_v47  ;;  %1475 = vst [vmem:[%s2305_s10 + $0x168] sm:$0xff] %v1411_v48  ;;  %vm1288_vm1 = vcmp.ge.f32.partialorder %v1224_v44, 0.0  ;;  %v1352_v54 = vmul.f32 0.01, %v1224_v44  ;;  %vm1254_vm2 = vcmp.ge.f32.partialorder %v1190_v49, 0.0  ;;  %v1193_v59 = vadd.f32 %v1738_v51, %v2296_v40 }
 0x174   : > { %v1318_v55 = vmul.f32 0.01, %v1190_v49  ;;  %vm1286_vm3 = vcmp.ge.f32.partialorder %v1222_v50, 0.0  ;;  %v1350_v56 = vmul.f32 0.01, %v1222_v50  ;;  %v1384_v57 = vsel %vm1256_vm0, %v1192_v43, %v1320_v53  ;;  %v912_v62 = vpop.f32.mrb[19].mxu1 }
 0x175   : > { %v1416_v58 = vsel %vm1288_vm1, %v1224_v44, %v1352_v54  ;;  %v1225_v60 = vadd.f32 %v1770_v52, %v2296_v40  ;;  %1448 = vst [vmem:[%s2305_s10 + $0x90] sm:$0xff] %v1384_v57  ;;  %v1191_v1 = vadd.f32 %v2296_v40, %v784_v61  ;;  %v1223_v2 = vadd.f32 %v2296_v40, %v912_v62 }
 0x176   : > { %1480 = vst [vmem:[%s2305_s10 + $0x190] sm:$0xff] %v1416_v58  ;;  %v1382_v63 = vsel %vm1254_vm2, %v1190_v49, %v1318_v55  ;;  %v1414_v0 = vsel %vm1286_vm3, %v1222_v50, %v1350_v56  ;;  %v1741_v3 = vpop.f32.mrb[20].mxu0  ;;  %v1773_v4 = vpop.f32.mrb[20].mxu1  ;;  %vm1257_vm4 = vcmp.ge.f32.partialorder %v1193_v59, 0.0  ;;  %v1321_v5 = vmul.f32 0.01, %v1193_v59 }
 0x177   : > { %1446 = vst [vmem:[%s2305_s10 + $0x80] sm:$0xff] %v1382_v63  ;;  %1478 = vst [vmem:[%s2305_s10 + $0x180] sm:$0xff] %v1414_v0  ;;  %vm1289_vm5 = vcmp.ge.f32.partialorder %v1225_v60, 0.0  ;;  %v1353_v6 = vmul.f32 0.01, %v1225_v60  ;;  %vm1255_vm6 = vcmp.ge.f32.partialorder %v1191_v1, 0.0  ;;  %v1196_v11 = vadd.f32 %v1741_v3, %v2296_v40 }
 0x178   : > { %v1319_v7 = vmul.f32 0.01, %v1191_v1  ;;  %vm1287_vm7 = vcmp.ge.f32.partialorder %v1223_v2, 0.0  ;;  %v1351_v8 = vmul.f32 0.01, %v1223_v2  ;;  %v1385_v9 = vsel %vm1257_vm4, %v1193_v59, %v1321_v5  ;;  %v797_v13 = vpop.f32.mrb[21].mxu0 }
 0x179   : > { %v1417_v10 = vsel %vm1289_vm5, %v1225_v60, %v1353_v6  ;;  %v1228_v12 = vadd.f32 %v1773_v4, %v2296_v40  ;;  %v925_v14 = vpop.f32.mrb[21].mxu1  ;;  %1449 = vst [vmem:[%s2305_s10 + $0x98] sm:$0xff] %v1385_v9  ;;  %v1194_v17 = vadd.f32 %v2296_v40, %v797_v13  ;;  %v1742_v19 = vpop.f32.mrb[22].mxu0  ;;  %vm1260_vm8 = vcmp.ge.f32.partialorder %v1196_v11, 0.0 }
 0x17a   : > { %1481 = vst [vmem:[%s2305_s10 + $0x198] sm:$0xff] %v1417_v10  ;;  %v1383_v15 = vsel %vm1255_vm6, %v1191_v1, %v1319_v7  ;;  %v1415_v16 = vsel %vm1287_vm7, %v1223_v2, %v1351_v8  ;;  %v1226_v18 = vadd.f32 %v2296_v40, %v925_v14  ;;  %v1774_v20 = vpop.f32.mrb[22].mxu1  ;;  %v1324_v21 = vmul.f32 0.01, %v1196_v11  ;;  %v800_v29 = vpop.f32.mrb[23].mxu0 }
 0x17b   : > { %1447 = vst [vmem:[%s2305_s10 + $0x88] sm:$0xff] %v1383_v15  ;;  %1479 = vst [vmem:[%s2305_s10 + $0x188] sm:$0xff] %v1415_v16  ;;  %vm1292_vm9 = vcmp.ge.f32.partialorder %v1228_v12, 0.0  ;;  %v1356_v22 = vmul.f32 0.01, %v1228_v12  ;;  %vm1258_vm10 = vcmp.ge.f32.partialorder %v1194_v17, 0.0  ;;  %v1197_v27 = vadd.f32 %v1742_v19, %v2296_v40 }
 0x17c   : > { %v1322_v23 = vmul.f32 0.01, %v1194_v17  ;;  %vm1290_vm11 = vcmp.ge.f32.partialorder %v1226_v18, 0.0  ;;  %v1354_v24 = vmul.f32 0.01, %v1226_v18  ;;  %v1388_v25 = vsel %vm1260_vm8, %v1196_v11, %v1324_v21  ;;  %v928_v30 = vpop.f32.mrb[23].mxu1 }
 0x17d   : > { %v1420_v26 = vsel %vm1292_vm9, %v1228_v12, %v1356_v22  ;;  %v1229_v28 = vadd.f32 %v1774_v20, %v2296_v40  ;;  %1452 = vst [vmem:[%s2305_s10 + $0xb0] sm:$0xff] %v1388_v25  ;;  %v1195_v33 = vadd.f32 %v2296_v40, %v800_v29  ;;  %v1227_v34 = vadd.f32 %v2296_v40, %v928_v30 }
 0x17e   : > { %1484 = vst [vmem:[%s2305_s10 + $0x1b0] sm:$0xff] %v1420_v26  ;;  %v1386_v31 = vsel %vm1258_vm10, %v1194_v17, %v1322_v23  ;;  %v1418_v32 = vsel %vm1290_vm11, %v1226_v18, %v1354_v24  ;;  %v1745_v35 = vpop.f32.mrb[24].mxu0  ;;  %v1777_v36 = vpop.f32.mrb[24].mxu1  ;;  %vm1261_vm12 = vcmp.ge.f32.partialorder %v1197_v27, 0.0  ;;  %v1325_v37 = vmul.f32 0.01, %v1197_v27 }
 0x17f   : > { %1450 = vst [vmem:[%s2305_s10 + $0xa0] sm:$0xff] %v1386_v31  ;;  %1482 = vst [vmem:[%s2305_s10 + $0x1a0] sm:$0xff] %v1418_v32  ;;  %vm1293_vm13 = vcmp.ge.f32.partialorder %v1229_v28, 0.0  ;;  %v1357_v38 = vmul.f32 0.01, %v1229_v28  ;;  %vm1259_vm14 = vcmp.ge.f32.partialorder %v1195_v33, 0.0  ;;  %v1200_v44 = vadd.f32 %v1745_v35, %v2296_v40 }
 0x180   : > { %v1323_v39 = vmul.f32 0.01, %v1195_v33  ;;  %vm1291_vm15 = vcmp.ge.f32.partialorder %v1227_v34, 0.0  ;;  %v1355_v41 = vmul.f32 0.01, %v1227_v34  ;;  %v1389_v42 = vsel %vm1261_vm12, %v1197_v27, %v1325_v37  ;;  %v813_v46 = vpop.f32.mrb[25].mxu0 }
 0x181   : > { %v1421_v43 = vsel %vm1293_vm13, %v1229_v28, %v1357_v38  ;;  %v1232_v45 = vadd.f32 %v1777_v36, %v2296_v40  ;;  %v941_v47 = vpop.f32.mrb[25].mxu1  ;;  %1453 = vst [vmem:[%s2305_s10 + $0xb8] sm:$0xff] %v1389_v42  ;;  %v1198_v50 = vadd.f32 %v2296_v40, %v813_v46  ;;  %v1746_v52 = vpop.f32.mrb[26].mxu0  ;;  %vm1264_vm0 = vcmp.ge.f32.partialorder %v1200_v44, 0.0 }
 0x182   : > { %1485 = vst [vmem:[%s2305_s10 + $0x1b8] sm:$0xff] %v1421_v43  ;;  %v1387_v48 = vsel %vm1259_vm14, %v1195_v33, %v1323_v39  ;;  %v1419_v49 = vsel %vm1291_vm15, %v1227_v34, %v1355_v41  ;;  %v1230_v51 = vadd.f32 %v2296_v40, %v941_v47  ;;  %v1778_v53 = vpop.f32.mrb[26].mxu1  ;;  %v1328_v54 = vmul.f32 0.01, %v1200_v44  ;;  %v816_v62 = vpop.f32.mrb[27].mxu0 }
 0x183   : > { %1451 = vst [vmem:[%s2305_s10 + $0xa8] sm:$0xff] %v1387_v48  ;;  %1483 = vst [vmem:[%s2305_s10 + $0x1a8] sm:$0xff] %v1419_v49  ;;  %vm1296_vm1 = vcmp.ge.f32.partialorder %v1232_v45, 0.0  ;;  %v1360_v55 = vmul.f32 0.01, %v1232_v45  ;;  %vm1262_vm2 = vcmp.ge.f32.partialorder %v1198_v50, 0.0  ;;  %v1201_v60 = vadd.f32 %v1746_v52, %v2296_v40 }
 0x184   : > { %v1326_v56 = vmul.f32 0.01, %v1198_v50  ;;  %vm1294_vm3 = vcmp.ge.f32.partialorder %v1230_v51, 0.0  ;;  %v1358_v57 = vmul.f32 0.01, %v1230_v51  ;;  %v1392_v58 = vsel %vm1264_vm0, %v1200_v44, %v1328_v54  ;;  %v944_v63 = vpop.f32.mrb[27].mxu1 }
 0x185   : > { %v1424_v59 = vsel %vm1296_vm1, %v1232_v45, %v1360_v55  ;;  %v1233_v61 = vadd.f32 %v1778_v53, %v2296_v40  ;;  %1456 = vst [vmem:[%s2305_s10 + $0xd0] sm:$0xff] %v1392_v58  ;;  %v1199_v2 = vadd.f32 %v2296_v40, %v816_v62  ;;  %v1231_v3 = vadd.f32 %v2296_v40, %v944_v63 }
 0x186   : > { %1488 = vst [vmem:[%s2305_s10 + $0x1d0] sm:$0xff] %v1424_v59  ;;  %v1390_v0 = vsel %vm1262_vm2, %v1198_v50, %v1326_v56  ;;  %v1422_v1 = vsel %vm1294_vm3, %v1230_v51, %v1358_v57  ;;  %v1749_v4 = vpop.f32.mrb[28].mxu0  ;;  %v1781_v5 = vpop.f32.mrb[28].mxu1  ;;  %vm1265_vm4 = vcmp.ge.f32.partialorder %v1201_v60, 0.0  ;;  %v1329_v6 = vmul.f32 0.01, %v1201_v60 }
 0x187   : > { %1454 = vst [vmem:[%s2305_s10 + $0xc0] sm:$0xff] %v1390_v0  ;;  %1486 = vst [vmem:[%s2305_s10 + $0x1c0] sm:$0xff] %v1422_v1  ;;  %vm1297_vm5 = vcmp.ge.f32.partialorder %v1233_v61, 0.0  ;;  %v1361_v7 = vmul.f32 0.01, %v1233_v61  ;;  %vm1263_vm6 = vcmp.ge.f32.partialorder %v1199_v2, 0.0  ;;  %v1204_v12 = vadd.f32 %v1749_v4, %v2296_v40 }
 0x188   : > { %v1327_v8 = vmul.f32 0.01, %v1199_v2  ;;  %vm1295_vm7 = vcmp.ge.f32.partialorder %v1231_v3, 0.0  ;;  %v1359_v9 = vmul.f32 0.01, %v1231_v3  ;;  %v1393_v10 = vsel %vm1265_vm4, %v1201_v60, %v1329_v6  ;;  %v829_v14 = vpop.f32.mrb[29].mxu0 }
 0x189   : > { %v1425_v11 = vsel %vm1297_vm5, %v1233_v61, %v1361_v7  ;;  %v1236_v13 = vadd.f32 %v1781_v5, %v2296_v40  ;;  %v957_v15 = vpop.f32.mrb[29].mxu1  ;;  %1457 = vst [vmem:[%s2305_s10 + $0xd8] sm:$0xff] %v1393_v10  ;;  %v1202_v18 = vadd.f32 %v2296_v40, %v829_v14  ;;  %v1750_v20 = vpop.f32.mrb[30].mxu0  ;;  %vm1268_vm8 = vcmp.ge.f32.partialorder %v1204_v12, 0.0 }
 0x18a   : > { %1489 = vst [vmem:[%s2305_s10 + $0x1d8] sm:$0xff] %v1425_v11  ;;  %v1391_v16 = vsel %vm1263_vm6, %v1199_v2, %v1327_v8  ;;  %v1423_v17 = vsel %vm1295_vm7, %v1231_v3, %v1359_v9  ;;  %v1234_v19 = vadd.f32 %v2296_v40, %v957_v15  ;;  %v1782_v21 = vpop.f32.mrb[30].mxu1  ;;  %v1332_v22 = vmul.f32 0.01, %v1204_v12  ;;  %v832_v30 = vpop.f32.mrb[31].mxu0 }
 0x18b   : > { %1455 = vst [vmem:[%s2305_s10 + $0xc8] sm:$0xff] %v1391_v16  ;;  %1487 = vst [vmem:[%s2305_s10 + $0x1c8] sm:$0xff] %v1423_v17  ;;  %vm1300_vm9 = vcmp.ge.f32.partialorder %v1236_v13, 0.0  ;;  %v1364_v23 = vmul.f32 0.01, %v1236_v13  ;;  %vm1266_vm10 = vcmp.ge.f32.partialorder %v1202_v18, 0.0  ;;  %v1205_v28 = vadd.f32 %v1750_v20, %v2296_v40 }
 0x18c   : > { %v1330_v24 = vmul.f32 0.01, %v1202_v18  ;;  %vm1298_vm11 = vcmp.ge.f32.partialorder %v1234_v19, 0.0  ;;  %v1362_v25 = vmul.f32 0.01, %v1234_v19  ;;  %v1396_v26 = vsel %vm1268_vm8, %v1204_v12, %v1332_v22  ;;  %v960_v31 = vpop.f32.mrb[31].mxu1 }
 0x18d   : > { %v1428_v27 = vsel %vm1300_vm9, %v1236_v13, %v1364_v23  ;;  %v1237_v29 = vadd.f32 %v1782_v21, %v2296_v40  ;;  %1460 = vst [vmem:[%s2305_s10 + $0xf0] sm:$0xff] %v1396_v26  ;;  %v1203_v34 = vadd.f32 %v2296_v40, %v832_v30  ;;  %v1235_v35 = vadd.f32 %v2296_v40, %v960_v31 }
 0x18e   : > { %1492 = vst [vmem:[%s2305_s10 + $0x1f0] sm:$0xff] %v1428_v27  ;;  %v1394_v32 = vsel %vm1266_vm10, %v1202_v18, %v1330_v24  ;;  %v1426_v33 = vsel %vm1298_vm11, %v1234_v19, %v1362_v25  ;;  %vm1269_vm12 = vcmp.ge.f32.partialorder %v1205_v28, 0.0  ;;  %v1333_v36 = vmul.f32 0.01, %v1205_v28 }
 0x18f   : > { %1458 = vst [vmem:[%s2305_s10 + $0xe0] sm:$0xff] %v1394_v32  ;;  %1490 = vst [vmem:[%s2305_s10 + $0x1e0] sm:$0xff] %v1426_v33  ;;  %vm1301_vm13 = vcmp.ge.f32.partialorder %v1237_v29, 0.0  ;;  %v1365_v37 = vmul.f32 0.01, %v1237_v29  ;;  %vm1267_vm14 = vcmp.ge.f32.partialorder %v1203_v34, 0.0 }
 0x190   : > { %v1331_v38 = vmul.f32 0.01, %v1203_v34  ;;  %vm1299_vm15 = vcmp.ge.f32.partialorder %v1235_v35, 0.0  ;;  %v1363_v39 = vmul.f32 0.01, %v1235_v35  ;;  %v1397_v40 = vsel %vm1269_vm12, %v1205_v28, %v1333_v36 }
 0x191   : > { %v1429_v41 = vsel %vm1301_vm13, %v1237_v29, %v1365_v37  ;;  %1461 = vst [vmem:[%s2305_s10 + $0xf8] sm:$0xff] %v1397_v40 }
 0x192   : > { %1493 = vst [vmem:[%s2305_s10 + $0x1f8] sm:$0xff] %v1429_v41  ;;  %v1395_v42 = vsel %vm1267_vm14, %v1203_v34, %v1331_v38  ;;  %v1427_v43 = vsel %vm1299_vm15, %v1235_v35, %v1363_v39 }
 0x193   : > { %1459 = vst [vmem:[%s2305_s10 + $0xe8] sm:$0xff] %v1395_v42  ;;  %1491 = vst [vmem:[%s2305_s10 + $0x1e8] sm:$0xff] %v1427_v43 }
 0x194   : > { %1987 = shalt.err (!%p1984_p5)
}
 0x195   : > { %s1988_s29 = scalar_lea.hbm %s2430_s19, 8192  ;;  %s1992_s20 = scalar_lea.hbm %s2488_s3, 16384 }
 0x196   : > { %p1989_p9 = scmp.ne.s32.totalorder %s2430_s19, %s1988_s29  ;;  %p1993_p3 = scmp.lt.u32.totalorder %s2430_s19, %s2488_s3 }
 0x197   : > { %p1994_p7 = scmp.lt.u32.totalorder %s1992_s20, %s1988_s29  ;;  %p1996_p4 = scmp.lt.u32.totalorder %s1988_s29, %s2430_s19 }
 0x198   : > { %p1990_p1 = pnand %p1989_p9, %p2188_p10 }
 0x199   : > { %p1995_p13 = por %p1994_p7, %p1993_p3 }
 0x19a   : > { %p1991_p2 = pneg %p1990_p1 }
 0x19b   : > { %p1997_p6 = por %p1996_p4, %p1995_p13 }
 0x19d   : > { %p1998_p8 = pnand %p1997_p6, %p1991_p2 }
 0x19f   : > { %2001 = shalt.err (!%p1998_p8)
}
 0x1a0   : > { %s2067_s10 = smov 128   ;;  %s2068_s11 = smov 8  }
 0x1a1   : > { %1805 = dma.vmem_to_hbm [thread:$0]  (%p2188_p10), %s2432_s9, 8192, %s2430_s19, %s1495_s25, %s2067_s10, %s2067_s10, %s2068_s11  }
 0x1a2 PF: > { %s1523_s15 = sand.u32 1, %s2040_s12   ;;  %p2506_p12 = scmp.ne.s32.totalorder %s2496_s23, 0 }
 0x1a3   : > { %p2507_p11 = scmp.ge.s32.totalorder %s2060_s17, 2  ;;  %s1524_s18 = scalar_lea.sflag [#allocation5], %s1523_s15 }
 0x1a5   : > { %p1816_p0 = pnand %p2507_p11, %p2506_p12 }
 0x1a7   : > { %2035 = dma.done.wait (!%p1816_p0), %s1524_s18, 8192  }
 0x1a8   : > { %2037 = vsyncadd (!%p1816_p0), %s1524_s18, 4294959104  ;;  %s20_s17 = sadd.s32 1, %s2060_s17   ;;  %s2508_s12 = smov %s2044_s13 }
 0x1a9   : > { %p17_p5 = scmp.ge.s32.totalorder %s20_s17, 4   ;;  %s2509_s13 = smov %s2048_s14 }
 0x1aa   : > { %s2510_s14 = smov %s2197_s5  ;;  %s2511_s15 = smov %s2056_s16 }
 0x1ab   : > { %s2512_s16 = smov %s2514_s28  ;;  %19 = sbr.rel (!%p17_p5) target bundleno = 7 (0x7), region = 90 }
 0x1b2   :  { %1529 = vsyncpa [#allocation4], 1 }
 0x1b3   :  { %1531 = vsyncpa [#allocation4 + $0x1], 1 }
 0x1b4   :  { %1532 = vsyncpa [#allocation7], 1 }
 0x1b5   :  { %1533 = vsyncpa [#allocation5], 1 }
 0x1b6   :  { %1535 = vsyncpa [#allocation5 + $0x1], 1 }

</bundles_post_ra>
